<compile_context>
chip_gen: v7x
topology: tpu7x:2x2x1
jax: 0.10.0
libtpu: 0.0.40
codegen_flags: <defaults>
</compile_context>

<pallas_src>
import jax
import jax.numpy as jnp
from jax.experimental import pallas as pl
from jax.experimental.pallas import tpu as pltpu

HIDDEN = 32      # hidden_size
VOCAB = 40       # output_size
MAXLEN = 10      # max_length


def _decoder_kernel(toks_ref,                      # SMEM scalar prefetch: (T,) int32
                    emb_ref,                       # (V, H)   embedding table (resident)
                    enc_ref,                       # (L, H)   encoder outputs (resident)
                    h0_ref,                        # (1, H)   initial hidden
                    attn_slab_ref,                 # (2H+1, L) [We ; Wh ; b]
                    comb_slab_ref,                 # (2H+1, H) [We ; Wa ; b]
                    grux_slab_ref,                 # (H+1, 3H) [Wir|Wiz|Win ; bir+bhr|biz+bhz|bin]
                    gruh_slab_ref,                 # (H+1, 3H) [Whr|Whz|Whn ; 0|0|bhn]
                    out_slab_ref,                  # (H+1, V)  [Wout ; bout]
                    logp_ref,                      # out (T, V)  resident accumulator
                    hseq_ref,                      # out (T, H)  resident accumulator
                    attnw_ref,                     # out (T, L)  resident accumulator
                    h_scratch):                    # VMEM (1, H) hidden-state carry
    f32 = jnp.float32
    H, V, L = HIDDEN, VOCAB, MAXLEN
    t = pl.program_id(0)

    @pl.when(t == 0)
    def _():
        h_scratch[...] = h0_ref[...]

    tok = toks_ref[t]
    embedded = emb_ref[pl.ds(tok, 1), :]           # (1, H) embedding lookup
    hidden = h_scratch[...]                        # (1, H)
    # TODO(synk): nn.Dropout omitted (eval / inference mode -> identity).

    # --- attention weights: softmax(cat(embedded, hidden) @ W_attn + b) — 1 dot
    eh = jnp.concatenate([embedded, hidden], axis=1)                       # (1, 2H)
    scores = (jnp.dot(eh, attn_slab_ref[pl.ds(0, 2 * H), :],
                      preferred_element_type=f32)
              + attn_slab_ref[pl.ds(2 * H, 1), :])                         # (1, L)
    scores = scores - jnp.max(scores, axis=1, keepdims=True)
    ex = jnp.exp(scores)
    attn_w = ex * pl.reciprocal(jnp.sum(ex, axis=1, keepdims=True))        # (1, L)

    # --- attn_applied = bmm(attn_weights, enc_outputs) ------------------------
    attn_applied = jnp.dot(attn_w, enc_ref[...], preferred_element_type=f32)  # (1, H)

    # --- attn_combine(cat(embedded, attn_applied)) + ReLU — 1 dot -------------
    ea = jnp.concatenate([embedded, attn_applied], axis=1)                 # (1, 2H)
    x = jnp.maximum(
        jnp.dot(ea, comb_slab_ref[pl.ds(0, 2 * H), :], preferred_element_type=f32)
        + comb_slab_ref[pl.ds(2 * H, 1), :], 0.0)                          # (1, H)

    # --- single-step GRU: gates fused into two (1,H)@(H,3H) dots --------------
    gx = (jnp.dot(x, grux_slab_ref[pl.ds(0, H), :], preferred_element_type=f32)
          + grux_slab_ref[pl.ds(H, 1), :])                                 # (1, 3H)
    gh = (jnp.dot(hidden, gruh_slab_ref[pl.ds(0, H), :], preferred_element_type=f32)
          + gruh_slab_ref[pl.ds(H, 1), :])                                 # (1, 3H)
    r = jax.nn.sigmoid(gx[:, 0:H] + gh[:, 0:H])
    z = jax.nn.sigmoid(gx[:, H:2 * H] + gh[:, H:2 * H])
    n = jnp.tanh(gx[:, 2 * H:3 * H] + r * gh[:, 2 * H:3 * H])
    h_new = (1.0 - z) * n + z * hidden                                     # (1, H)

    # --- output Linear + log_softmax — 1 dot ----------------------------------
    logits = (jnp.dot(h_new, out_slab_ref[pl.ds(0, H), :], preferred_element_type=f32)
              + out_slab_ref[pl.ds(H, 1), :])                              # (1, V)
    m = jnp.max(logits, axis=1, keepdims=True)
    shifted = logits - m
    lse = jnp.log(jnp.sum(jnp.exp(shifted), axis=1, keepdims=True))

    # --- carry hidden state; write per-step rows into resident outputs --------
    h_scratch[...] = h_new
    logp_ref[pl.ds(t, 1), :] = shifted - lse
    hseq_ref[pl.ds(t, 1), :] = h_new
    attnw_ref[pl.ds(t, 1), :] = attn_w


def pack_params(params):
    """Host-side packing of the 23 PyTorch tensors into 6 lane-dense slabs."""
    attn_slab = jnp.concatenate(
        [params["attn_we"], params["attn_wh"], params["attn_b"]], axis=0)   # (2H+1, L)
    comb_slab = jnp.concatenate(
        [params["comb_we"], params["comb_wa"], params["comb_b"]], axis=0)   # (2H+1, H)
    w_gx = jnp.concatenate([params["wir"], params["wiz"], params["win"]], axis=1)  # (H, 3H)
    b_gx = jnp.concatenate([params["bir"] + params["bhr"],
                            params["biz"] + params["bhz"],
                            params["bin"]], axis=1)                         # (1, 3H)
    grux_slab = jnp.concatenate([w_gx, b_gx], axis=0)                       # (H+1, 3H)
    w_gh = jnp.concatenate([params["whr"], params["whz"], params["whn"]], axis=1)
    b_gh = jnp.concatenate([jnp.zeros_like(params["bhr"]),
                            jnp.zeros_like(params["bhz"]),
                            params["bhn"]], axis=1)                         # (1, 3H)
    gruh_slab = jnp.concatenate([w_gh, b_gh], axis=0)                       # (H+1, 3H)
    out_slab = jnp.concatenate([params["outw"], params["outb"]], axis=0)    # (H+1, V)
    return {"emb": params["emb"], "attn": attn_slab, "comb": comb_slab,
            "gru_x": grux_slab, "gru_h": gruh_slab, "out": out_slab}


def attn_decoder_forward(packed, tokens, hidden, enc_outputs):
    """Run T sequential AttnDecoderRNN steps inside one pallas_call.

    tokens: (T,) int32; hidden: (1,1,H) f32; enc_outputs: (L,H) f32.
    Returns (logp (T,V), final_hidden (1,1,H), attn_weights (T,L)).
    T=1 reproduces exactly the original single-step module forward.
    """
    H, V, L = HIDDEN, VOCAB, MAXLEN
    T = tokens.shape[0]
    hid2d = hidden.reshape(1, H)

    tensor_inputs = [packed["emb"], enc_outputs, hid2d,
                     packed["attn"], packed["comb"],
                     packed["gru_x"], packed["gru_h"], packed["out"]]

    def resident(arr):
        # full-array block + constant index_map -> DMA'd once, stays in VMEM.
        return pl.BlockSpec(arr.shape, lambda t, toks: (0, 0))

    in_specs = [resident(a) for a in tensor_inputs]
    out_specs = [
        pl.BlockSpec((T, V), lambda t, toks: (0, 0)),
        pl.BlockSpec((T, H), lambda t, toks: (0, 0)),
        pl.BlockSpec((T, L), lambda t, toks: (0, 0)),
    ]
    out_shape = (
        jax.ShapeDtypeStruct((T, V), jnp.float32),
        jax.ShapeDtypeStruct((T, H), jnp.float32),
        jax.ShapeDtypeStruct((T, L), jnp.float32),
    )

    logp, hseq, attn_w = pl.pallas_call(
        _decoder_kernel,
        out_shape=out_shape,
        grid_spec=pltpu.PrefetchScalarGridSpec(
            num_scalar_prefetch=1,
            grid=(T,),
            in_specs=in_specs,
            out_specs=out_specs,
            scratch_shapes=[pltpu.VMEM((1, H), jnp.float32)],
        ),
        compiler_params=pltpu.CompilerParams(
            # time steps are serial (hidden-state dependence) -> "arbitrary"
            dimension_semantics=("arbitrary",)),
    )(tokens.astype(jnp.int32), *tensor_inputs)

    return logp, hseq[T - 1:T].reshape(1, 1, H), attn_w


def reference_forward(params, tok, hidden, enc_outputs):
    """Pure-JAX single-step reference matching the PyTorch forward (eval mode)."""
    H = HIDDEN
    emb = params["emb"][tok[0]].reshape(1, H)
    hid = hidden.reshape(1, H)
    scores = emb @ params["attn_we"] + hid @ params["attn_wh"] + params["attn_b"]
    attn_w = jax.nn.softmax(scores, axis=1)
    applied = attn_w @ enc_outputs
    x = jax.nn.relu(emb @ params["comb_we"] + applied @ params["comb_wa"] + params["comb_b"])
    r = jax.nn.sigmoid(x @ params["wir"] + params["bir"] + hid @ params["whr"] + params["bhr"])
    z = jax.nn.sigmoid(x @ params["wiz"] + params["biz"] + hid @ params["whz"] + params["bhz"])
    n = jnp.tanh(x @ params["win"] + params["bin"] + r * (hid @ params["whn"] + params["bhn"]))
    h_new = (1.0 - z) * n + z * hid
    logits = h_new @ params["outw"] + params["outb"]
    logp = jax.nn.log_softmax(logits, axis=1)
    return logp, h_new.reshape(1, 1, H), attn_w


def init_params(key):
    H, V, L = HIDDEN, VOCAB, MAXLEN
    keys = jax.random.split(key, 24)
    s = 0.1

    def mk(k, shape):
        return jax.random.normal(k, shape, dtype=jnp.float32) * s

    return {
        "emb":     mk(keys[0], (V, H)),
        # attn: Linear(2H -> L), split along (embedded | hidden) input halves.
        "attn_we": mk(keys[1], (H, L)),
        "attn_wh": mk(keys[2], (H, L)),
        "attn_b":  mk(keys[3], (1, L)),
        # attn_combine: Linear(2H -> H), split along (embedded | attn_applied).
        "comb_we": mk(keys[4], (H, H)),
        "comb_wa": mk(keys[5], (H, H)),
        "comb_b":  mk(keys[6], (1, H)),
        # GRU (r, z, n gates), weights stored pre-transposed as (in, out).
        "wir": mk(keys[7],  (H, H)), "wiz": mk(keys[8],  (H, H)), "win": mk(keys[9],  (H, H)),
        "whr": mk(keys[10], (H, H)), "whz": mk(keys[11], (H, H)), "whn": mk(keys[12], (H, H)),
        "bir": mk(keys[13], (1, H)), "biz": mk(keys[14], (1, H)), "bin": mk(keys[15], (1, H)),
        "bhr": mk(keys[16], (1, H)), "bhz": mk(keys[17], (1, H)), "bhn": mk(keys[18], (1, H)),
        # out: Linear(H -> V)
        "outw": mk(keys[19], (H, V)),
        "outb": mk(keys[20], (1, V)),
    }


if __name__ == "__main__":
    key = jax.random.PRNGKey(0)
    pkey, hkey, ekey, tkey = jax.random.split(key, 4)

    params = init_params(pkey)
    packed = pack_params(params)

    T = 4
    tokens = jax.random.randint(tkey, (T,), 0, VOCAB, dtype=jnp.int32)
    hidden0 = jax.random.normal(hkey, (1, 1, HIDDEN), dtype=jnp.float32)
    enc_outputs = jax.random.normal(ekey, (MAXLEN, HIDDEN), dtype=jnp.float32)

    # --- multi-step call: T decoder steps fused into one pallas_call ----------
    logp_seq, h_final, attn_seq = attn_decoder_forward(packed, tokens, hidden0, enc_outputs)
    jax.block_until_ready((logp_seq, h_final, attn_seq))

    # reference: loop the single-step pure-JAX forward T times
    hid = hidden0
    ref_logps, ref_attns = [], []
    for i in range(T):
        lp, hid, aw = reference_forward(params, tokens[i:i + 1], hid, enc_outputs)
        ref_logps.append(lp)
        ref_attns.append(aw)
    ref_logp_seq = jnp.concatenate(ref_logps, axis=0)
    ref_attn_seq = jnp.concatenate(ref_attns, axis=0)

    assert jnp.allclose(logp_seq, ref_logp_seq, atol=1e-5, rtol=1e-5), "log_softmax mismatch"
    assert jnp.allclose(attn_seq, ref_attn_seq, atol=1e-5, rtol=1e-5), "attention weights mismatch"
    assert jnp.allclose(h_final, hid, atol=1e-5, rtol=1e-5), "final hidden mismatch"

    # --- single-step call (T=1): exactly the original module's forward --------
    lp1, h1, aw1 = attn_decoder_forward(packed, tokens[:1], hidden0, enc_outputs)
    jax.block_until_ready((lp1, h1, aw1))
    r_lp1, r_h1, r_aw1 = reference_forward(params, tokens[:1], hidden0, enc_outputs)
    assert jnp.allclose(lp1, r_lp1, atol=1e-5, rtol=1e-5), "single-step logp mismatch"
    assert jnp.allclose(h1, r_h1, atol=1e-5, rtol=1e-5), "single-step hidden mismatch"
    assert jnp.allclose(aw1, r_aw1, atol=1e-5, rtol=1e-5), "single-step attn mismatch"

    print("KERNEL_OK")
</pallas_src>

<mosaic_0001>
module attributes {stable_mosaic.version = 11 : i64} {
  func.func @_decoder_kernel(%arg0: i32, %arg1: memref<4xi32, #tpu.memory_space<smem>>, %arg2: memref<40x32xf32, #tpu.memory_space<vmem>>, %arg3: memref<10x32xf32, #tpu.memory_space<vmem>>, %arg4: memref<1x32xf32, #tpu.memory_space<vmem>>, %arg5: memref<65x10xf32, #tpu.memory_space<vmem>>, %arg6: memref<65x32xf32, #tpu.memory_space<vmem>>, %arg7: memref<33x96xf32, #tpu.memory_space<vmem>>, %arg8: memref<33x96xf32, #tpu.memory_space<vmem>>, %arg9: memref<33x40xf32, #tpu.memory_space<vmem>>, %arg10: memref<4x40xf32, #tpu.memory_space<vmem>>, %arg11: memref<4x32xf32, #tpu.memory_space<vmem>>, %arg12: memref<4x10xf32, #tpu.memory_space<vmem>>, %arg13: memref<1x32xf32, #tpu.memory_space<vmem>>) attributes {dimension_semantics = [#tpu.dimension_semantics<arbitrary>], iteration_bounds = array<i64: 4>, scalar_prefetch = 1 : i64, scratch_operands = 1 : i64, tpu.core_type = #tpu.core_type<tc>, window_params = [{pipeline_mode = #tpu.pipeline_mode<synchronous>, transform_indices = @transform_0, window_bounds = array<i64: 40, 32>}, {pipeline_mode = #tpu.pipeline_mode<synchronous>, transform_indices = @transform_1, window_bounds = array<i64: 10, 32>}, {pipeline_mode = #tpu.pipeline_mode<synchronous>, transform_indices = @transform_2, window_bounds = array<i64: 1, 32>}, {pipeline_mode = #tpu.pipeline_mode<synchronous>, transform_indices = @transform_3, window_bounds = array<i64: 65, 10>}, {pipeline_mode = #tpu.pipeline_mode<synchronous>, transform_indices = @transform_4, window_bounds = array<i64: 65, 32>}, {pipeline_mode = #tpu.pipeline_mode<synchronous>, transform_indices = @transform_5, window_bounds = array<i64: 33, 96>}, {pipeline_mode = #tpu.pipeline_mode<synchronous>, transform_indices = @transform_6, window_bounds = array<i64: 33, 96>}, {pipeline_mode = #tpu.pipeline_mode<synchronous>, transform_indices = @transform_7, window_bounds = array<i64: 33, 40>}, {pipeline_mode = #tpu.pipeline_mode<synchronous>, transform_indices = @transform_8, window_bounds = array<i64: 4, 40>}, {pipeline_mode = #tpu.pipeline_mode<synchronous>, transform_indices = @transform_9, window_bounds = array<i64: 4, 32>}, {pipeline_mode = #tpu.pipeline_mode<synchronous>, transform_indices = @transform_10, window_bounds = array<i64: 4, 10>}]} {
    %c0_i32 = arith.constant 0 : i32
    %0 = arith.cmpi eq, %arg0, %c0_i32 : i32
    %1 = arith.extui %0 : i1 to i32
    %c0_i32_0 = arith.constant 0 : i32
    %2 = arith.cmpi ne, %1, %c0_i32_0 : i32
    scf.if %2 {
      %c0_41 = arith.constant 0 : index
      %c0_42 = arith.constant 0 : index
      %87 = vector.load %arg4[%c0_41, %c0_42] : memref<1x32xf32, #tpu.memory_space<vmem>>, vector<1x32xf32>
      %c0_43 = arith.constant 0 : index
      %c0_44 = arith.constant 0 : index
      %88 = vector.load %arg13[%c0_43, %c0_44] : memref<1x32xf32, #tpu.memory_space<vmem>>, vector<1x32xf32>
      tpu.vector_store %arg13[%c0_43, %c0_44], %87 {strides = array<i32>} : memref<1x32xf32, #tpu.memory_space<vmem>>, vector<1x32xf32>,
    } else {
    }
    %3 = arith.index_cast %arg0 : i32 to index
    %4 = memref.load %arg1[%3] : memref<4xi32, #tpu.memory_space<smem>>
    %5 = arith.index_cast %4 : i32 to index
    %c0 = arith.constant 0 : index
    %6 = vector.load %arg2[%5, %c0] : memref<40x32xf32, #tpu.memory_space<vmem>>, vector<1x32xf32>
    %c0_1 = arith.constant 0 : index
    %c0_2 = arith.constant 0 : index
    %7 = vector.load %arg13[%c0_1, %c0_2] : memref<1x32xf32, #tpu.memory_space<vmem>>, vector<1x32xf32>
    %8 = tpu.concatenate %6, %7 in 1 : vector<1x32xf32>, vector<1x32xf32> -> vector<1x64xf32>
    %c0_3 = arith.constant 0 : index
    %c0_4 = arith.constant 0 : index
    %9 = vector.load %arg5[%c0_3, %c0_4] : memref<65x10xf32, #tpu.memory_space<vmem>>, vector<64x10xf32>
    %cst = arith.constant dense<0.000000e+00> : vector<1x10xf32>
    %10 = tpu.matmul %8, %9, %cst {dimension_numbers = #tpu.dot_dimension_numbers<[1], [0], [0], [1], [0, 0, 1, 1], [], []>} : vector<1x64xf32>, vector<64x10xf32>, vector<1x10xf32> -> vector<1x10xf32>
    %c64 = arith.constant 64 : index
    %c0_5 = arith.constant 0 : index
    %11 = vector.load %arg5[%c64, %c0_5] : memref<65x10xf32, #tpu.memory_space<vmem>>, vector<1x10xf32>
    %12 = arith.addf %10, %11 : vector<1x10xf32>
    %cst_6 = arith.constant dense<0xFF800000> : vector<1xf32>
    %13 = vector.multi_reduction <maximumf>, %12, %cst_6 [1] : vector<1x10xf32> to vector<1xf32>
    %14 = vector.shape_cast %13 : vector<1xf32> to vector<1x1xf32>
    %15 = vector.broadcast %14 : vector<1x1xf32> to vector<1x10xf32>
    %16 = arith.subf %12, %15 : vector<1x10xf32>
    %17 = math.exp %16 : vector<1x10xf32>
    %cst_7 = arith.constant dense<0.000000e+00> : vector<1xf32>
    %18 = vector.multi_reduction <add>, %17, %cst_7 [1] : vector<1x10xf32> to vector<1xf32>
    %19 = vector.shape_cast %18 : vector<1xf32> to vector<1x1xf32>
    %20 = tpu.reciprocal %19 : vector<1x1xf32> -> vector<1x1xf32>
    %21 = vector.broadcast %20 : vector<1x1xf32> to vector<1x10xf32>
    %22 = arith.mulf %17, %21 : vector<1x10xf32>
    %c0_8 = arith.constant 0 : index
    %c0_9 = arith.constant 0 : index
    %23 = vector.load %arg3[%c0_8, %c0_9] : memref<10x32xf32, #tpu.memory_space<vmem>>, vector<10x32xf32>
    %cst_10 = arith.constant dense<0.000000e+00> : vector<1x32xf32>
    %24 = tpu.matmul %22, %23, %cst_10 {dimension_numbers = #tpu.dot_dimension_numbers<[1], [0], [0], [1], [0, 0, 1, 1], [], []>} : vector<1x10xf32>, vector<10x32xf32>, vector<1x32xf32> -> vector<1x32xf32>
    %25 = tpu.concatenate %6, %24 in 1 : vector<1x32xf32>, vector<1x32xf32> -> vector<1x64xf32>
    %c0_11 = arith.constant 0 : index
    %c0_12 = arith.constant 0 : index
    %26 = vector.load %arg6[%c0_11, %c0_12] : memref<65x32xf32, #tpu.memory_space<vmem>>, vector<64x32xf32>
    %cst_13 = arith.constant dense<0.000000e+00> : vector<1x32xf32>
    %27 = tpu.matmul %25, %26, %cst_13 {dimension_numbers = #tpu.dot_dimension_numbers<[1], [0], [0], [1], [0, 0, 1, 1], [], []>} : vector<1x64xf32>, vector<64x32xf32>, vector<1x32xf32> -> vector<1x32xf32>
    %c64_14 = arith.constant 64 : index
    %c0_15 = arith.constant 0 : index
    %28 = vector.load %arg6[%c64_14, %c0_15] : memref<65x32xf32, #tpu.memory_space<vmem>>, vector<1x32xf32>
    %29 = arith.addf %27, %28 : vector<1x32xf32>
    %cst_16 = arith.constant 0.000000e+00 : f32
    %30 = vector.broadcast %cst_16 : f32 to vector<1x32xf32>
    %31 = arith.maximumf %29, %30 : vector<1x32xf32>
    %c0_17 = arith.constant 0 : index
    %c0_18 = arith.constant 0 : index
    %32 = vector.load %arg7[%c0_17, %c0_18] : memref<33x96xf32, #tpu.memory_space<vmem>>, vector<32x96xf32>
    %cst_19 = arith.constant dense<0.000000e+00> : vector<1x96xf32>
    %33 = tpu.matmul %31, %32, %cst_19 {dimension_numbers = #tpu.dot_dimension_numbers<[1], [0], [0], [1], [0, 0, 1, 1], [], []>} : vector<1x32xf32>, vector<32x96xf32>, vector<1x96xf32> -> vector<1x96xf32>
    %c32 = arith.constant 32 : index
    %c0_20 = arith.constant 0 : index
    %34 = vector.load %arg7[%c32, %c0_20] : memref<33x96xf32, #tpu.memory_space<vmem>>, vector<1x96xf32>
    %35 = arith.addf %33, %34 : vector<1x96xf32>
    %c0_21 = arith.constant 0 : index
    %c0_22 = arith.constant 0 : index
    %36 = vector.load %arg8[%c0_21, %c0_22] : memref<33x96xf32, #tpu.memory_space<vmem>>, vector<32x96xf32>
    %cst_23 = arith.constant dense<0.000000e+00> : vector<1x96xf32>
    %37 = tpu.matmul %7, %36, %cst_23 {dimension_numbers = #tpu.dot_dimension_numbers<[1], [0], [0], [1], [0, 0, 1, 1], [], []>} : vector<1x32xf32>, vector<32x96xf32>, vector<1x96xf32> -> vector<1x96xf32>
    %c32_24 = arith.constant 32 : index
    %c0_25 = arith.constant 0 : index
    %38 = vector.load %arg8[%c32_24, %c0_25] : memref<33x96xf32, #tpu.memory_space<vmem>>, vector<1x96xf32>
    %39 = arith.addf %37, %38 : vector<1x96xf32>
    %40 = vector.extract_strided_slice %35 {offsets = [0, 0], sizes = [1, 32], strides = [1, 1]} : vector<1x96xf32> to vector<1x32xf32>
    %41 = vector.extract_strided_slice %39 {offsets = [0, 0], sizes = [1, 32], strides = [1, 1]} : vector<1x96xf32> to vector<1x32xf32>
    %42 = arith.addf %40, %41 : vector<1x32xf32>
    %43 = arith.negf %42 : vector<1x32xf32>
    %44 = math.exp %43 : vector<1x32xf32>
    %cst_26 = arith.constant 1.000000e+00 : f32
    %45 = vector.broadcast %cst_26 : f32 to vector<1x32xf32>
    %46 = arith.addf %45, %44 : vector<1x32xf32>
    %47 = arith.divf %45, %46 : vector<1x32xf32>
    %48 = vector.extract_strided_slice %35 {offsets = [0, 32], sizes = [1, 32], strides = [1, 1]} : vector<1x96xf32> to vector<1x32xf32>
    %49 = vector.extract_strided_slice %39 {offsets = [0, 32], sizes = [1, 32], strides = [1, 1]} : vector<1x96xf32> to vector<1x32xf32>
    %50 = arith.addf %48, %49 : vector<1x32xf32>
    %51 = arith.negf %50 : vector<1x32xf32>
    %52 = math.exp %51 : vector<1x32xf32>
    %cst_27 = arith.constant 1.000000e+00 : f32
    %53 = vector.broadcast %cst_27 : f32 to vector<1x32xf32>
    %54 = arith.addf %53, %52 : vector<1x32xf32>
    %55 = arith.divf %53, %54 : vector<1x32xf32>
    %56 = vector.extract_strided_slice %35 {offsets = [0, 64], sizes = [1, 32], strides = [1, 1]} : vector<1x96xf32> to vector<1x32xf32>
    %57 = vector.extract_strided_slice %39 {offsets = [0, 64], sizes = [1, 32], strides = [1, 1]} : vector<1x96xf32> to vector<1x32xf32>
    %58 = arith.mulf %47, %57 : vector<1x32xf32>
    %59 = arith.addf %56, %58 : vector<1x32xf32>
    %60 = math.tanh %59 : vector<1x32xf32>
    %cst_28 = arith.constant 1.000000e+00 : f32
    %61 = vector.broadcast %cst_28 : f32 to vector<1x32xf32>
    %62 = arith.subf %61, %55 : vector<1x32xf32>
    %63 = arith.mulf %62, %60 : vector<1x32xf32>
    %64 = arith.mulf %55, %7 : vector<1x32xf32>
    %65 = arith.addf %63, %64 : vector<1x32xf32>
    %c0_29 = arith.constant 0 : index
    %c0_30 = arith.constant 0 : index
    %66 = vector.load %arg9[%c0_29, %c0_30] : memref<33x40xf32, #tpu.memory_space<vmem>>, vector<32x40xf32>
    %cst_31 = arith.constant dense<0.000000e+00> : vector<1x40xf32>
    %67 = tpu.matmul %65, %66, %cst_31 {dimension_numbers = #tpu.dot_dimension_numbers<[1], [0], [0], [1], [0, 0, 1, 1], [], []>} : vector<1x32xf32>, vector<32x40xf32>, vector<1x40xf32> -> vector<1x40xf32>
    %c32_32 = arith.constant 32 : index
    %c0_33 = arith.constant 0 : index
    %68 = vector.load %arg9[%c32_32, %c0_33] : memref<33x40xf32, #tpu.memory_space<vmem>>, vector<1x40xf32>
    %69 = arith.addf %67, %68 : vector<1x40xf32>
    %cst_34 = arith.constant dense<0xFF800000> : vector<1xf32>
    %70 = vector.multi_reduction <maximumf>, %69, %cst_34 [1] : vector<1x40xf32> to vector<1xf32>
    %71 = vector.shape_cast %70 : vector<1xf32> to vector<1x1xf32>
    %72 = vector.broadcast %71 : vector<1x1xf32> to vector<1x40xf32>
    %73 = arith.subf %69, %72 : vector<1x40xf32>
    %74 = math.exp %73 : vector<1x40xf32>
    %cst_35 = arith.constant dense<0.000000e+00> : vector<1xf32>
    %75 = vector.multi_reduction <add>, %74, %cst_35 [1] : vector<1x40xf32> to vector<1xf32>
    %76 = vector.shape_cast %75 : vector<1xf32> to vector<1x1xf32>
    %77 = math.log %76 : vector<1x1xf32>
    %c0_36 = arith.constant 0 : index
    %c0_37 = arith.constant 0 : index
    %78 = vector.load %arg13[%c0_36, %c0_37] : memref<1x32xf32, #tpu.memory_space<vmem>>, vector<1x32xf32>
    tpu.vector_store %arg13[%c0_36, %c0_37], %65 {strides = array<i32>} : memref<1x32xf32, #tpu.memory_space<vmem>>, vector<1x32xf32>,
    %79 = vector.broadcast %77 : vector<1x1xf32> to vector<1x40xf32>
    %80 = arith.subf %73, %79 : vector<1x40xf32>
    %81 = arith.index_cast %arg0 : i32 to index
    %c0_38 = arith.constant 0 : index
    %82 = vector.load %arg10[%81, %c0_38] : memref<4x40xf32, #tpu.memory_space<vmem>>, vector<1x40xf32>
    tpu.vector_store %arg10[%81, %c0_38], %80 {strides = array<i32>} : memref<4x40xf32, #tpu.memory_space<vmem>>, vector<1x40xf32>,
    %83 = arith.index_cast %arg0 : i32 to index
    %c0_39 = arith.constant 0 : index
    %84 = vector.load %arg11[%83, %c0_39] : memref<4x32xf32, #tpu.memory_space<vmem>>, vector<1x32xf32>
    tpu.vector_store %arg11[%83, %c0_39], %65 {strides = array<i32>} : memref<4x32xf32, #tpu.memory_space<vmem>>, vector<1x32xf32>,
    %85 = arith.index_cast %arg0 : i32 to index
    %c0_40 = arith.constant 0 : index
    %86 = vector.load %arg12[%85, %c0_40] : memref<4x10xf32, #tpu.memory_space<vmem>>, vector<1x10xf32>
    tpu.vector_store %arg12[%85, %c0_40], %22 {strides = array<i32>} : memref<4x10xf32, #tpu.memory_space<vmem>>, vector<1x10xf32>,
    return
  }
  func.func @transform_0(%arg0: i32, %arg1: memref<4xi32, #tpu.memory_space<smem>>) -> (i32, i32) {
    %c0_i32 = arith.constant 0 : i32
    %c0_i32_0 = arith.constant 0 : i32
    %c0_i32_1 = arith.constant 0 : i32
    return %c0_i32, %c0_i32_0 : i32, i32
  }
  func.func @transform_1(%arg0: i32, %arg1: memref<4xi32, #tpu.memory_space<smem>>) -> (i32, i32) {
    %c0_i32 = arith.constant 0 : i32
    %c0_i32_0 = arith.constant 0 : i32
    %c0_i32_1 = arith.constant 0 : i32
    return %c0_i32, %c0_i32_0 : i32, i32
  }
  func.func @transform_2(%arg0: i32, %arg1: memref<4xi32, #tpu.memory_space<smem>>) -> (i32, i32) {
    %c0_i32 = arith.constant 0 : i32
    %c0_i32_0 = arith.constant 0 : i32
    %c0_i32_1 = arith.constant 0 : i32
    return %c0_i32, %c0_i32_0 : i32, i32
  }
  func.func @transform_3(%arg0: i32, %arg1: memref<4xi32, #tpu.memory_space<smem>>) -> (i32, i32) {
    %c0_i32 = arith.constant 0 : i32
    %c0_i32_0 = arith.constant 0 : i32
    %c0_i32_1 = arith.constant 0 : i32
    return %c0_i32, %c0_i32_0 : i32, i32
  }
  func.func @transform_4(%arg0: i32, %arg1: memref<4xi32, #tpu.memory_space<smem>>) -> (i32, i32) {
    %c0_i32 = arith.constant 0 : i32
    %c0_i32_0 = arith.constant 0 : i32
    %c0_i32_1 = arith.constant 0 : i32
    return %c0_i32, %c0_i32_0 : i32, i32
  }
  func.func @transform_5(%arg0: i32, %arg1: memref<4xi32, #tpu.memory_space<smem>>) -> (i32, i32) {
    %c0_i32 = arith.constant 0 : i32
    %c0_i32_0 = arith.constant 0 : i32
    %c0_i32_1 = arith.constant 0 : i32
    return %c0_i32, %c0_i32_0 : i32, i32
  }
  func.func @transform_6(%arg0: i32, %arg1: memref<4xi32, #tpu.memory_space<smem>>) -> (i32, i32) {
    %c0_i32 = arith.constant 0 : i32
    %c0_i32_0 = arith.constant 0 : i32
    %c0_i32_1 = arith.constant 0 : i32
    return %c0_i32, %c0_i32_0 : i32, i32
  }
  func.func @transform_7(%arg0: i32, %arg1: memref<4xi32, #tpu.memory_space<smem>>) -> (i32, i32) {
    %c0_i32 = arith.constant 0 : i32
    %c0_i32_0 = arith.constant 0 : i32
    %c0_i32_1 = arith.constant 0 : i32
    return %c0_i32, %c0_i32_0 : i32, i32
  }
  func.func @transform_8(%arg0: i32, %arg1: memref<4xi32, #tpu.memory_space<smem>>) -> (i32, i32) {
    %c0_i32 = arith.constant 0 : i32
    %c0_i32_0 = arith.constant 0 : i32
    %c0_i32_1 = arith.constant 0 : i32
    return %c0_i32, %c0_i32_0 : i32, i32
  }
  func.func @transform_9(%arg0: i32, %arg1: memref<4xi32, #tpu.memory_space<smem>>) -> (i32, i32) {
    %c0_i32 = arith.constant 0 : i32
    %c0_i32_0 = arith.constant 0 : i32
    %c0_i32_1 = arith.constant 0 : i32
    return %c0_i32, %c0_i32_0 : i32, i32
  }
  func.func @transform_10(%arg0: i32, %arg1: memref<4xi32, #tpu.memory_space<smem>>) -> (i32, i32) {
    %c0_i32 = arith.constant 0 : i32
    %c0_i32_0 = arith.constant 0 : i32
    %c0_i32_1 = arith.constant 0 : i32
    return %c0_i32, %c0_i32_0 : i32, i32
  }
}

</mosaic_0001>

<bundles_post_ra>
// kernel: tpu_custom_call.1
= control target key start
LH: loop header
LB: loop body
LE: loop exit
PB: predicated region body
PF: predicated region fallthrough
CT: control target
= control target key end

     0   :  { %s1648_s0 = inlined_call_operand.vmem [shape: s32[4], index: 0, kind: input, shape index: {}]   ;;  %s1649_s1 = inlined_call_operand.vmem [shape: f32[40,32], index: 1, kind: input, shape index: {}]   ;;  %s1650_s2 = inlined_call_operand.vmem [shape: f32[10,32], index: 2, kind: input, shape index: {}]   ;;  %s1651_s3 = inlined_call_operand.vmem [shape: f32[1,32], index: 3, kind: input, shape index: {}]   ;;  %s1652_s4 = inlined_call_operand.vmem [shape: f32[65,10], index: 4, kind: input, shape index: {}]   ;;  %s1653_s5 = inlined_call_operand.vmem [shape: f32[65,32], index: 5, kind: input, shape index: {}]   ;;  %s1654_s6 = inlined_call_operand.vmem [shape: f32[33,96], index: 6, kind: input, shape index: {}]   ;;  %s1655_s7 = inlined_call_operand.vmem [shape: f32[33,96], index: 7, kind: input, shape index: {}]   ;;  %s1656_s8 = inlined_call_operand.vmem [shape: f32[33,40], index: 8, kind: input, shape index: {}]   ;;  %s1657_s9 = inlined_call_operand.hbm [shape: f32[4,40], index: 9, kind: output, shape index: {0}]   ;;  %s1658_s10 = inlined_call_operand.hbm [shape: f32[4,32], index: 10, kind: output, shape index: {1}]   ;;  %s1659_s11 = inlined_call_operand.hbm [shape: f32[4,10], index: 11, kind: output, shape index: {2}]  }
   0x1   :  { %s17_s19 = sshll.u32 %s1648_s0, 4  ;;  %s18_s19 = int_to_ptr.vmem [resolvable:$true] %s17_s19 }
   0x2   :  { %s1220_s20 = scalar_lea.vmem %s18_s19, 16  ;;  %p1225_p1 = scmp.lt.s32.totalorder %s18_s19, %s18_s19 }
   0x3   :  { %p1221_p0 = scmp.ne.s32.totalorder %s18_s19, %s1220_s20  ;;  %p1226_p2 = scmp.lt.s32.totalorder %s1220_s20, %s1220_s20 }
   0x5   :  { %p1227_p3 = por %p1226_p2, %p1225_p1 }
   0x7   :  { %p1228_p4 = pnand %p1227_p3, %p1221_p0 }
   0x9   :  { %1231 = shalt.err (!%p1228_p4)  }
   0xa   :  { %s1328_s21 = smov [#allocation4]  }
   0xb   :  { %20 = dma.vmem_to_smem %s18_s19, 16, %s1328_s21, [#allocation3] }
   0xc   :  { %1314 = dma.done.wait [#allocation3], 16 }
   0xd   :  { %1315 = vsyncadd [#allocation3], 4294967280 }
   0xe   :  { %22 = sfence }
   0xf   :  { %23 = vsyncpa [#allocation6], 0 }
  0x10   :  { %24 = vsyncpa [#allocation8], 0  ;;  %s1402_s22 = smov 0  }
  0x11 LB: > { %s1408_s0 = sadd.s32 4294967295, %s1326_s22   ;;  %p979_p5 = scmp.ge.s32.totalorder %s1326_s22, 1  ;;  %s1326_s22 = sphi %s1402_s22, %s30_s22  }
  0x12   : > { %p301_p6 = scmp.lt.s32.totalorder %s1326_s22, 5 }
  0x14   : > { %p302_p7 = pnand %p979_p5, %p301_p6 }
  0x15   : > { %p980_p8 = scmp.ne.s32.totalorder (!%p302_p7), %s1408_s0, 0 }
  0x16   : > { %305 = sbr.rel (%p302_p7) target bundleno = 2385 (0x951), region = 52 }
  0x1d   : > { %332 = sbr.rel (%p980_p8) target bundleno = 36 (0x24), region = 56  ;;  %v333_v0 = vld [vmem:[%s1651_s3] sm:$0x1] (!%p980_p8)  ;;  %vm334_vm0 = vcmask (!%p980_p8), 253952  }
  0x1e   : > { %335 = vst.msk [vmem:[#allocation2] sm:$0x1] (!%p980_p8), %vm334_vm0, %v333_v0 }
  0x24 PF: > { %v341_v1 = vlaneseq  ;;  %v350_v2 = vld [vmem:[%s1652_s4] sm:$0xff]  ;;  %v351_v3 = vld [vmem:[%s1652_s4 + $0x8] sm:$0xff]  ;;  %v1329_v4 = vmov 0.0|0.0   ;;  %v352_v6 = vld [vmem:[%s1652_s4 + $0x10] sm:$0xff]  ;;  %vm1330_vm1 = vmmov 0   ;;  %v1331_v11 = vmov 0.0  }
  0x25   : > { %1123 = vmatprep.subr.bf16.mxu0 %v1329_v4  ;;  %v1124_v5 = vpack.c.bf16 %v351_v3, %v350_v2  ;;  %v353_v7 = vld [vmem:[%s1652_s4 + $0x18] sm:$0xff]  ;;  %1135 = vmatprep.subr.bf16.mxu1 %v1329_v4  ;;  %v1430_v9 = vld [vmem:[#allocation2] sm:$0x1]  ;;  %v355_v14 = vld [vmem:[%s1652_s4 + $0x28] sm:$0xff]  ;;  %s1332_s18 = smov 32   ;;  %s336_s24 = sld [smem:[#allocation4 + %s1408_s0]] }
  0x26   : > { %v342_v8 = vshrl.u32 %v341_v1, 7  ;;  %v1127_v10 = vpack.c.bf16 %v353_v7, %v352_v6  ;;  %1061 = vmatprep.mubr.msk.f32.mxu0 %vm1330_vm1, %v1331_v11  ;;  %v354_v13 = vld [vmem:[%s1652_s4 + $0x20] sm:$0xff]  ;;  %1068 = vmatprep.mubr.msk.f32.mxu1 %vm1330_vm1, %v1331_v11  ;;  %v356_v17 = vld [vmem:[%s1652_s4 + $0x30] sm:$0xff]  ;;  %v357_v18 = vld [vmem:[%s1652_s4 + $0x38] sm:$0xff]  ;;  %vm348_vm2 = vcmask 261120   ;;  %vm359_vm3 = vcmask 523264  }
  0x27   : > { %1125 = vmatpush3.bf16.msra.mxu0 %v1124_v5  ;;  %v1130_v16 = vpack.c.bf16 %v355_v14, %v354_v13  ;;  %v1133_v19 = vpack.c.bf16 %v357_v18, %v356_v17  ;;  %v358_v23 = vld [vmem:[%s1652_s4 + $0x40] sm:$0x1]  ;;  %vm433_vm4 = vcmask 73728   ;;  %v446_v34 = vld [vmem:[%s1650_s2 + $0x8] sm:$0x3]  ;;  %vm451_vm5 = vcmask 1041408  }
  0x28   : > { %v343_v12 = vsub.s32 0, %v342_v8  ;;  %1126 = vmatprep.subr.bf16.mxu0 %v1329_v4  ;;  %v445_v33 = vld [vmem:[%s1650_s2] sm:$0xff]  ;;  %vm1333_vm6 = vmmov 1   ;;  %vm447_vm8 = vcmask 80896   ;;  %s1006_s15 = scalar_lea.vmem [#allocation9], %s1326_s22  ;;  %v531_v40 = vld [vmem:[%s1653_s5 + $0x8] sm:$0xff] }
  0x29   : > { %v1136_v35 = vpack.c.bf16 %v446_v34, %v445_v33  ;;  %vm1137_vm7 = vmpackc.low %vm451_vm5, %vm1333_vm6  ;;  %v530_v39 = vld [vmem:[%s1653_s5] sm:$0xff]  ;;  %v532_v41 = vld [vmem:[%s1653_s5 + $0x10] sm:$0xff]  ;;  %s1334_s17 = smov 64   ;;  %s1335_s29 = smov 96   ;;  %vm887_vm9 = vcmask 253952   ;;  %vm874_vm10 = vcmask 319488  }
  0x2a   : > { %v344_v15 = vrot.slane %v1430_v9, %v343_v12  ;;  %v1140_v42 = vpack.c.bf16 %v531_v40, %v530_v39  ;;  %v533_v43 = vld [vmem:[%s1653_s5 + $0x18] sm:$0xff]  ;;  %v534_v45 = vld [vmem:[%s1653_s5 + $0x20] sm:$0xff]  ;;  %v535_v46 = vld [vmem:[%s1653_s5 + $0x28] sm:$0xff]  ;;  %s1003_s30 = scalar_lea.vmem [#allocation7], %s1326_s22  ;;  %p1181_p9 = scmp.eq.s32.totalorder %s1408_s0, 3 }
  0x2b   : > { %1128 = vmatpush3.bf16.msra.mxu0 %v1127_v10  ;;  %s337_s27 = scalar_lea.vmem %s1649_s1, %s336_s24  ;;  %1138 = vmatpush3.bf16.msk.msra.mxu1 %vm1137_vm7, %v1136_v35  ;;  %v1143_v44 = vpack.c.bf16 %v533_v43, %v532_v41  ;;  %v1146_v47 = vpack.c.bf16 %v535_v46, %v534_v45  ;;  %v536_v48 = vld [vmem:[%s1653_s5 + $0x30] sm:$0xff]  ;;  %v537_v49 = vld [vmem:[%s1653_s5 + $0x38] sm:$0xff]  ;;  %v613_v51 = vld [vmem:[%s1654_s6] sm:$0xff]  ;;  %s1336_s14 = smov [#allocation7]  }
  0x2c   : > { %345 = vrot.lane.b32.xlu0 %v344_v15, %s1332_s18  ;;  %1129 = vmatprep.subr.bf16.mxu0 %v1329_v4  ;;  %v1458_v20 = vld [vmem:[%s337_s27] sm:$0x1]  ;;  %v1149_v50 = vpack.c.bf16 %v537_v49, %v536_v48  ;;  %v614_v52 = vld [vmem:[%s1654_s6 + $0x8] sm:$0xff]  ;;  %v693_v60 = vld [vmem:[%s1655_s7 + $0x10] sm:$0xff] }
  0x2d   : > { %1139 = vmatprep.subr.bf16.mxu1 %v1329_v4  ;;  %v1152_v53 = vpack.c.bf16 %v614_v52, %v613_v51  ;;  %v691_v56 = vld [vmem:[%s1655_s7] sm:$0xff]  ;;  %v692_v57 = vld [vmem:[%s1655_s7 + $0x8] sm:$0xff]  ;;  %v694_v61 = vld [vmem:[%s1655_s7 + $0x18] sm:$0xff] }
  0x2e   : > { %v1158_v58 = vpack.c.bf16 %v692_v57, %v691_v56  ;;  %v1161_v63 = vpack.c.bf16 %v694_v61, %v693_v60  ;;  %v615_v0 = vld [vmem:[%s1654_s6 + $0x10] sm:$0xff]  ;;  %v616_v1 = vld [vmem:[%s1654_s6 + $0x18] sm:$0xff]  ;;  %v538_v3 = vld [vmem:[%s1653_s5 + $0x40] sm:$0x1] }
  0x2f   : > { %1131 = vmatpush3.bf16.msra.mxu0 %v1130_v16  ;;  %v1155_v2 = vpack.c.bf16 %v616_v1, %v615_v0  ;;  %v617_v14 = vld [vmem:[%s1654_s6 + $0x20] sm:$0x1] }
  0x30   : > { %1132 = vmatprep.subr.bf16.mxu0 %v1329_v4 }
  0x33   : > { %1134 = vmatpush3.bf16.msra.mxu0 %v1133_v19 }
  0x34   : > { %1151 = vmatprep.subr.bf16.mxu0 %v1329_v4 }
  0x9e   : > { %v1460_v21 = vpop.permute.xlu0 %345 }
  0x9f   : > { %v349_v22 = vsel %vm348_vm2, %v1458_v20, %v1460_v21 }
  0xa0   : > { %1062 = vmatmul.mubr.msk.f32.vlgmr.msra.gmra.mrb[0].mxu0 %vm359_vm3, %v349_v22 }
  0xa1   : > { %1098 = vmatprep.mubr.msk.f32.mxu0 %vm1330_vm1, %v1331_v11  ;;  %1153 = vmatpush3.bf16.msra.mxu0 %v1152_v53 }
  0xa2   : > { %1154 = vmatprep.subr.bf16.mxu0 %v1329_v4 }
  0xa5   : > { %1156 = vmatpush3.bf16.msra.mxu0 %v1155_v2 }
  0xa6   : > { %1163 = vmatprep.subr.bf16.mxu0 %v1329_v4 }
 0x173   : > { %v429_v24 = vpop.f32.mrb[0].mxu0 }
 0x174   : > { %v430_v25 = vadd.f32 %v429_v24, %v358_v23  ;;  %v1063_v26 = vpop.f32.mrb[1].mxu0 }
 0x176   : > { %v434_v27 = vsel %vm433_vm4, %v430_v25, -inf }
 0x177   : > { %435 = vmax.xlane.f32.xlu0 %v434_v27  ;;  %v794_v27 = vld [vmem:[%s1656_s8] sm:$0xff] }
 0x204   : > { %v436_v28 = vpop.xlane.xlu0 %435 }
 0x205   : > { %v437_v29 = vsub.f32 %v430_v25, %v436_v28  ;;  %v795_v28 = vld [vmem:[%s1656_s8 + $0x8] sm:$0xff] }
 0x207   : > { %v438_v30 = vmul.f32 1.442695, %v437_v29  ;;  %v796_v29 = vld [vmem:[%s1656_s8 + $0x10] sm:$0xff] }
 0x209   : > { %1206 = vpow2.f32 %v438_v30  ;;  %v1164_v30 = vpack.c.bf16 %v795_v28, %v794_v27 }
 0x213   : > { %v1207_v31 = vpop.eup %1206 }
 0x214   : > { %v440_v32 = vsel %vm433_vm4, %v1207_v31, 0.0 }
 0x215   : > { %441 = vadd.xlane.f32.xlu1 %v440_v32 }
 0x2a2   : > { %v442_v36 = vpop.xlane.xlu1 %441 }
 0x2a3   : > { %1208 = vrcp.f32 %v442_v36 }
 0x2ad   : > { %v1209_v37 = vpop.eup %1208 }
 0x2ae   : > { %v444_v38 = vmul.f32 %v1209_v37, %v1207_v31  ;;  %v797_v31 = vld [vmem:[%s1656_s8 + $0x18] sm:$0xff] }
 0x2af   : > { %v1167_v32 = vpack.c.bf16 %v797_v31, %v796_v29 }
 0x2b0   : > { %1069 = vmatmul.mubr.msk.f32.vlgmr.msra.gmra.mrb[0].mxu1 %vm447_vm8, %v444_v38  ;;  %1008 = vst.msk [vmem:[%s1006_s15 - $0x1] sm:$0x1] %vm433_vm4, %v444_v38  ;;  %s914_s15 = sshll.u32 %s1336_s14, 4  ;;  %s915_s15 = int_to_ptr.vmem [resolvable:$true] %s914_s15 }
 0x2b1   : > { %1087 = vmatprep.mubr.msk.f32.mxu1 %vm1330_vm1, %v1331_v11  ;;  %1141 = vmatpush3.bf16.msra.mxu1 %v1140_v42  ;;  %s1232_s16 = scalar_lea.vmem %s915_s15, 64  ;;  %p1239_p13 = scmp.lt.s32.totalorder %s915_s15, %s915_s15 }
 0x2b2   : > { %1142 = vmatprep.subr.bf16.mxu1 %v1329_v4  ;;  %p1233_p10 = scmp.ne.s32.totalorder %s915_s15, %s1232_s16  ;;  %p1240_p0 = scmp.lt.s32.totalorder %s1232_s16, %s1232_s16 }
 0x2b4   : > { %p1234_p11 = pnand %p1233_p10, %p1181_p9  ;;  %p1241_p1 = por %p1240_p0, %p1239_p13 }
 0x2b5   : > { %1144 = vmatpush3.bf16.msra.mxu1 %v1143_v44 }
 0x2b6   : > { %1145 = vmatprep.subr.bf16.mxu1 %v1329_v4  ;;  %p1235_p12 = pneg %p1234_p11 }
 0x2b8   : > { %p1242_p2 = pnand %p1241_p1, %p1235_p12 }
 0x2b9   : > { %1147 = vmatpush3.bf16.msra.mxu1 %v1146_v47 }
 0x2ba   : > { %1148 = vmatprep.subr.bf16.mxu1 %v1329_v4 }
 0x2bd   : > { %1150 = vmatpush3.bf16.msra.mxu1 %v1149_v50 }
 0x2be   : > { %1157 = vmatprep.subr.bf16.mxu1 %v1329_v4 }
 0x383   : > { %v521_v54 = vpop.f32.mrb[0].mxu1 }
 0x384   : > { %526 = vrot.lane.b32.xlu1 %v521_v54, %s1332_s18  ;;  %v1070_v55 = vpop.f32.mrb[1].mxu1 }
 0x3f6   : > { %v527_v59 = vpop.permute.xlu1 %526 }
 0x3f7   : > { %v529_v62 = vsel %vm348_vm2, %v1458_v20, %v527_v59 }
 0x3f8   : > { %1088 = vmatmul.mubr.msk.f32.vlgmr.msra.gmra.mrb[2].mxu1 %vm359_vm3, %v529_v62 }
 0x3f9   : > { %1159 = vmatpush3.bf16.msra.mxu1 %v1158_v58  ;;  %1109 = vmatprep.mubr.msk.f32.mxu1 %vm1330_vm1, %v1331_v11 }
 0x3fa   : > { %1160 = vmatprep.subr.bf16.mxu1 %v1329_v4 }
 0x3fd   : > { %1162 = vmatpush3.bf16.msra.mxu1 %v1161_v63 }
 0x400   : > { %1110 = vmatmul.mubr.msk.f32.vlgmr.msra.gmra.mrb[4].mxu1 %vm348_vm2, %v1430_v9  ;;  %v695_v9 = vld [vmem:[%s1655_s7 + $0x20] sm:$0x1] }
 0x4cb   : > { %v608_v5 = vpop.f32.mrb[2].mxu1 }
 0x4cc   : > { %v609_v6 = vadd.f32 %v608_v5, %v538_v3  ;;  %v1089_v7 = vpop.f32.mrb[3].mxu1 }
 0x4ce   : > { %v612_v8 = vmax.f32 %v609_v6, 0.0 }
 0x4d0   : > { %1099 = vmatmul.mubr.msk.f32.vlgmr.msra.gmra.mrb[2].mxu0 %vm348_vm2, %v612_v8 }
 0x4d1   : > { %1120 = vmatprep.mubr.msk.f32.mxu0 %vm1330_vm1, %v1331_v11  ;;  %1165 = vmatpush3.bf16.msra.mxu0 %v1164_v30 }
 0x4d2   : > { %1166 = vmatprep.subr.bf16.mxu0 %v1329_v4  ;;  %v798_v4 = vld [vmem:[%s1656_s8 + $0x20] sm:$0x1] }
 0x4d3   : > { %v764_v10 = vpop.f32.mrb[4].mxu1 }
 0x4d4   : > { %v765_v12 = vadd.f32 %v764_v10, %v695_v9  ;;  %v1111_v13 = vpop.f32.mrb[5].mxu1 }
 0x4d5   : > { %1168 = vmatpush3.bf16.msra.mxu0 %v1167_v32 }
 0x4d6   : > { %776 = vrot.lane.b32.xlu1 %v765_v12, %s1334_s17 }
 0x548   : > { %v777_v23 = vpop.permute.xlu1 %776 }
 0x5a3   : > { %v687_v15 = vpop.f32.mrb[2].mxu0 }
 0x5a4   : > { %v688_v16 = vadd.f32 %v687_v15, %v617_v14  ;;  %v1100_v17 = vpop.f32.mrb[3].mxu0 }
 0x5a6   : > { %v768_v18 = vadd.f32 %v765_v12, %v688_v16 }
 0x5a8   : > { %v987_v19 = vmul.f32 -1.442695, %v768_v18 }
 0x5aa   : > { %1210 = vpow2.f32 %v987_v19 }
 0x5b4   : > { %v1211_v20 = vpop.eup %1210 }
 0x5b5   : > { %v772_v22 = vadd.f32 1.0, %v1211_v20 }
 0x5b7   : > { %1212 = vrcp.f32 %v772_v22 }
 0x5c1   : > { %v1213_v11 = vpop.eup %1212 }
 0x5c2   : > { %v779_v24 = vmul.f32 %v1213_v11, %v777_v23  ;;  %v786_v34 = vsub.f32 1.0, %v1213_v11  ;;  %v792_v36 = vmul.f32 %v1213_v11, %v1460_v21 }
 0x5c4   : > { %781 = vrot.lane.b32.xlu1 %v779_v24, %s1334_s17 }
 0x636   : > { %v782_v25 = vpop.permute.xlu1 %781 }
 0x637   : > { %v784_v26 = vadd.f32 %v782_v25, %v688_v16 }
 0x639   : > { %1214 = vtanh.f32 %v784_v26 }
 0x643   : > { %v1215_v33 = vpop.eup %1214 }
 0x644   : > { %788 = vrot.lane.b32.xlu1 %v1215_v33, %s1335_s29 }
 0x6b6   : > { %v789_v35 = vpop.permute.xlu1 %788 }
 0x6b7   : > { %v791_v37 = vmul.f32 %v789_v35, %v786_v34 }
 0x6b9   : > { %v793_v38 = vadd.f32 %v792_v36, %v791_v37 }
 0x6bb   : > { %800 = vrot.lane.b32.xlu1 %v793_v38, %s1335_s29 }
 0x72d   : > { %v801_v39 = vpop.permute.xlu1 %800 }
 0x72e   : > { %888 = vst.msk [vmem:[#allocation2] sm:$0x1] %vm887_vm9, %v801_v39  ;;  %1121 = vmatmul.mubr.msk.f32.vlgmr.msra.gmra.mrb[4].mxu0 %vm348_vm2, %v801_v39  ;;  %1005 = vst.msk [vmem:[%s1003_s30 - $0x1] sm:$0x1] %vm887_vm9, %v801_v39 }
 0x801   : > { %v870_v40 = vpop.f32.mrb[4].mxu0 }
 0x802   : > { %v871_v41 = vadd.f32 %v870_v40, %v798_v4  ;;  %v1122_v42 = vpop.f32.mrb[5].mxu0 }
 0x804   : > { %v875_v21 = vsel %vm874_vm10, %v871_v41, -inf }
 0x805   : > { %876 = vmax.xlane.f32.xlu0 %v875_v21 }
 0x892   : > { %v877_v43 = vpop.xlane.xlu0 %876 }
 0x893   : > { %v878_v44 = vsub.f32 %v871_v41, %v877_v43 }
 0x895   : > { %v879_v45 = vmul.f32 1.442695, %v878_v44 }
 0x897   : > { %1216 = vpow2.f32 %v879_v45 }
 0x8a1   : > { %v1217_v46 = vpop.eup %1216 }
 0x8a2   : > { %v881_v47 = vsel %vm874_vm10, %v1217_v46, 0.0 }
 0x8a3   : > { %882 = vadd.xlane.f32.xlu1 %v881_v47 }
 0x8a4   : > { %1245 = shalt.err (!%p1242_p2)
}
 0x8a5   : > { %s1246_s20 = scalar_lea.hbm %s1658_s10, 64 }
 0x8a6   : > { %p1247_p3 = scmp.ne.s32.totalorder %s1658_s10, %s1246_s20  ;;  %p1252_p6 = scmp.lt.u32.totalorder %s1246_s20, %s1658_s10 }
 0x8a8   : > { %p1248_p4 = pnand %p1247_p3, %p1181_p9 }
 0x8aa   : > { %p1249_p5 = pneg %p1248_p4 }
 0x8ac   : > { %p1254_p7 = pnand %p1252_p6, %p1249_p5 }
 0x8ae   : > { %1257 = shalt.err (!%p1254_p7)
}
 0x8af   : > { %1172 = dma.vmem_to_hbm [thread:$0]  (%p1181_p9), %s915_s15, 64, %s1658_s10, [#allocation8]  }
 0x8b0   : > { %s1337_s28 = smov [#allocation9]  }
 0x8b1   : > { %s925_s18 = sshll.u32 %s1337_s28, 4  ;;  %s926_s18 = int_to_ptr.vmem [resolvable:$true] %s925_s18 }
 0x8b2   : > { %s1258_s29 = scalar_lea.vmem %s926_s18, 64  ;;  %p1265_p12 = scmp.lt.s32.totalorder %s926_s18, %s926_s18 }
 0x8b3   : > { %p1259_p8 = scmp.ne.s32.totalorder %s926_s18, %s1258_s29  ;;  %p1266_p13 = scmp.lt.s32.totalorder %s1258_s29, %s1258_s29 }
 0x8b5   : > { %p1260_p10 = pnand %p1259_p8, %p1181_p9  ;;  %p1267_p0 = por %p1266_p13, %p1265_p12 }
 0x8b7   : > { %p1261_p11 = pneg %p1260_p10 }
 0x8b9   : > { %p1268_p1 = pnand %p1267_p0, %p1261_p11 }
 0x8bb   : > { %1271 = shalt.err (!%p1268_p1)
}
 0x8bc   : > { %s1272_s13 = scalar_lea.hbm %s1659_s11, 64 }
 0x8bd   : > { %p1273_p2 = scmp.ne.s32.totalorder %s1659_s11, %s1272_s13  ;;  %p1278_p5 = scmp.lt.u32.totalorder %s1272_s13, %s1659_s11 }
 0x8bf   : > { %p1274_p3 = pnand %p1273_p2, %p1181_p9 }
 0x8c1   : > { %p1275_p4 = pneg %p1274_p3 }
 0x8c3   : > { %p1280_p6 = pnand %p1278_p5, %p1275_p4 }
 0x8c5   : > { %1283 = shalt.err (!%p1280_p6)
}
 0x8c6   : > { %1174 = dma.vmem_to_hbm [thread:$0]  (%p1181_p9), %s926_s18, 64, %s1659_s11, [#allocation8]  }
 0x8c7   : > { %s1338_s21 = smov [#allocation5]   ;;  %s1000_s24 = scalar_lea.vmem [#allocation5], %s1326_s22 }
 0x8c8   : > { %s903_s23 = sshll.u32 %s1338_s21, 4  ;;  %s904_s23 = int_to_ptr.vmem [resolvable:$true] %s903_s23 }
 0x8c9   : > { %s1284_s25 = scalar_lea.vmem %s904_s23, 64  ;;  %p1291_p11 = scmp.lt.s32.totalorder %s904_s23, %s904_s23 }
 0x8ca   : > { %p1285_p7 = scmp.ne.s32.totalorder %s904_s23, %s1284_s25  ;;  %p1292_p12 = scmp.lt.s32.totalorder %s1284_s25, %s1284_s25 }
 0x8cc   : > { %p1286_p8 = pnand %p1285_p7, %p1181_p9  ;;  %p1293_p13 = por %p1292_p12, %p1291_p11 }
 0x8ce   : > { %p1287_p10 = pneg %p1286_p8 }
 0x8d0   : > { %p1294_p0 = pnand %p1293_p13, %p1287_p10 }
 0x930   : > { %v883_v48 = vpop.xlane.xlu1 %882 }
 0x931   : > { %1218 = vlog2.f32 %v883_v48 }
 0x93b   : > { %v1219_v49 = vpop.eup %1218 }
 0x93c   : > { %v885_v50 = vmul.f32 0.6931472, %v1219_v49 }
 0x93e   : > { %v889_v51 = vsub.f32 %v878_v44, %v885_v50 }
 0x940   : > { %1002 = vst.msk [vmem:[%s1000_s24 - $0x1] sm:$0x1] %vm874_vm10, %v889_v51 }
 0x941   : > { %1297 = shalt.err (!%p1294_p0)
}
 0x942   : > { %s1298_s28 = scalar_lea.hbm %s1657_s9, 64 }
 0x943   : > { %p1299_p1 = scmp.ne.s32.totalorder %s1657_s9, %s1298_s28  ;;  %p1304_p4 = scmp.lt.u32.totalorder %s1298_s28, %s1657_s9 }
 0x945   : > { %p1300_p2 = pnand %p1299_p1, %p1181_p9 }
 0x947   : > { %p1301_p3 = pneg %p1300_p2 }
 0x949   : > { %p1306_p5 = pnand %p1304_p4, %p1301_p3 }
 0x94b   : > { %1309 = shalt.err (!%p1306_p5)
}
 0x94c   : > { %1170 = dma.vmem_to_hbm [thread:$0]  (%p1181_p9), %s904_s23, 64, %s1657_s9, [#allocation6]  }
 0x94d   : > { %1317 = dma.done.wait (%p1181_p9), [#allocation6], 64  }
 0x94e   : > { %1319 = vsyncadd (%p1181_p9), [#allocation6], 4294967232 }
 0x94f   : > { %1321 = dma.done.wait (%p1181_p9), [#allocation8], 128  }
 0x950   : > { %1323 = vsyncadd (%p1181_p9), [#allocation8], 4294967168 }
 0x951 PF: > { %s30_s22 = sadd.s32 1, %s1326_s22  }
 0x952   : > { %p27_p6 = scmp.ge.s32.totalorder %s30_s22, 6  }
 0x954   :  { %29 = sbr.rel (!%p27_p6) target bundleno = 17 (0x11), region = 100 }
 0x95b   :  { %946 = vsyncpa [#allocation6], 1 }
 0x95c   :  { %948 = vsyncpa [#allocation6 + $0x1], 1 }
 0x95d   :  { %949 = vsyncpa [#allocation8], 1 }

</bundles_post_ra>
